<compile_context>
chip_gen: v6e
topology: v6e:2x2x1
jax: 0.10.0
libtpu: 0.0.40
codegen_flags: <defaults>
</compile_context>

<pallas_src>
import functools

import jax
import jax.numpy as jnp
from jax.experimental import pallas as pl
from jax.experimental.pallas import tpu as pltpu


# -------------------- config (SMALL, consistent with the module) --------------------
BATCH = 2
Q_LEN = 8
KV_LEN = 16
HIDDEN = 64
NUM_HEADS = 4
NUM_KV_HEADS = 2
HEAD_DIM = HIDDEN // NUM_HEADS          # 16
NUM_KV_GROUPS = NUM_HEADS // NUM_KV_HEADS
RMS_EPS = 1e-6
SCALING = HEAD_DIM ** -0.5

# dot_general dimension_numbers: contract last dim of x with last dim of w
# (i.e. x @ w.T for an nn.Linear-style (out, in) weight) -- no transposes.
_DN_LAST_LAST = (((1,), (1,)), ((), ()))


# -------------------- fused Pallas kernel --------------------
def _fused_cross_attn_kernel(hs_ref, xs_ref, mask_ref,
                             wq_ref, wkv_ref, wo_ref,
                             qnw_ref, knw_ref,
                             out_ref, aw_ref,
                             *, scaling, eps, num_heads, num_kv_heads, head_dim):
    f32 = jnp.float32
    groups = num_heads // num_kv_heads
    D = head_dim
    q_len = hs_ref.shape[0]

    hs = hs_ref[...].astype(f32)                      # (Q, H)
    xs = xs_ref[...].astype(f32)                      # (KV, H)
    mask = mask_ref[...].astype(f32)                  # (Q, KV)

    # --- projections (MXU), weights kept in (out, in) layout ---
    q_full = jax.lax.dot_general(hs, wq_ref[...].astype(f32), _DN_LAST_LAST,
                                 preferred_element_type=f32)     # (Q, nH*D)
    kv_full = jax.lax.dot_general(xs, wkv_ref[...].astype(f32), _DN_LAST_LAST,
                                  preferred_element_type=f32)    # (KV, 2*nKV*D)
    k_dim = num_kv_heads * D
    k_full = kv_full[:, :k_dim]                        # (KV, nKV*D)
    v_full = kv_full[:, k_dim:]                        # (KV, nKV*D)

    qn_w = qnw_ref[...].astype(f32)                    # (1, D)
    kn_w = knw_ref[...].astype(f32)                    # (1, D)

    def rms(x, w):
        var = jnp.mean(x * x, axis=-1, keepdims=True)
        return x * jax.lax.rsqrt(var + eps) * w

    outs = []
    probs = []
    mask_g = jnp.tile(mask, (groups, 1))               # (groups*Q, KV)

    # One pass per KV head; query heads of the group stacked along sublanes.
    for g in range(num_kv_heads):
        k_g = rms(k_full[:, g * D:(g + 1) * D], kn_w)  # K normalized once per KV head
        v_g = v_full[:, g * D:(g + 1) * D]             # (KV, D)

        h0 = g * groups
        q_g = jnp.concatenate(
            [rms(q_full[:, (h0 + r) * D:(h0 + r + 1) * D], qn_w)
             for r in range(groups)], axis=0)          # (groups*Q, D)

        # scores: contract last dims of q_g and k_g -> (groups*Q, KV), no k.T
        s = jax.lax.dot_general(q_g, k_g, _DN_LAST_LAST,
                                preferred_element_type=f32) * scaling
        s = s + mask_g

        # fp32 softmax (matches torch softmax(dim=-1, dtype=float32))
        m = jnp.max(s, axis=-1, keepdims=True)
        e = jnp.exp(s - m)
        p = e / jnp.sum(e, axis=-1, keepdims=True)     # (groups*Q, KV)

        o_g = jnp.dot(p, v_g, preferred_element_type=f32)   # (groups*Q, D)

        for r in range(groups):
            outs.append(o_g[r * q_len:(r + 1) * q_len, :])
            probs.append(p[r * q_len:(r + 1) * q_len, :])

    attn = jnp.concatenate(outs, axis=-1)              # (Q, nH*D), head h at lanes h*D
    aw_ref[...] = jnp.concatenate(probs, axis=-1).astype(aw_ref.dtype)  # (Q, nH*KV)

    # output projection, again contracting without a transpose
    out = jax.lax.dot_general(attn, wo_ref[...].astype(f32), _DN_LAST_LAST,
                              preferred_element_type=f32)    # (Q, H)
    out_ref[...] = out.astype(out_ref.dtype)


# -------------------- wrapper --------------------
def prepare_kernel_params(params):
    """One-time parameter prep: fuse k/v weights, reshape norm weights."""
    return {
        "w_q": params["q_proj"],                                           # (nH*D, H)
        "w_kv": jnp.concatenate([params["k_proj"], params["v_proj"]], 0),  # (2*nKV*D, H)
        "w_o": params["o_proj"],                                           # (H, nH*D)
        "q_norm_w": params["q_norm_w"].reshape(1, HEAD_DIM),
        "k_norm_w": params["k_norm_w"].reshape(1, HEAD_DIM),
    }


def mllama_text_cross_attention(kparams, hidden_states, cross_attention_states,
                                attention_mask):
    b, q_len, hidden = hidden_states.shape
    kv_len = cross_attention_states.shape[1]

    kernel = functools.partial(
        _fused_cross_attn_kernel,
        scaling=SCALING, eps=RMS_EPS,
        num_heads=NUM_HEADS, num_kv_heads=NUM_KV_HEADS, head_dim=HEAD_DIM)

    out, aw_packed = pl.pallas_call(
        kernel,
        grid=(b,),
        in_specs=[
            pl.BlockSpec((None, q_len, hidden), lambda bi: (bi, 0, 0)),
            pl.BlockSpec((None, kv_len, hidden), lambda bi: (bi, 0, 0)),
            pl.BlockSpec((None, None, q_len, kv_len), lambda bi: (bi, 0, 0, 0)),
            pl.BlockSpec((NUM_HEADS * HEAD_DIM, hidden), lambda bi: (0, 0)),
            pl.BlockSpec((2 * NUM_KV_HEADS * HEAD_DIM, hidden), lambda bi: (0, 0)),
            pl.BlockSpec((hidden, NUM_HEADS * HEAD_DIM), lambda bi: (0, 0)),
            pl.BlockSpec((1, HEAD_DIM), lambda bi: (0, 0)),
            pl.BlockSpec((1, HEAD_DIM), lambda bi: (0, 0)),
        ],
        out_specs=[
            pl.BlockSpec((None, q_len, hidden), lambda bi: (bi, 0, 0)),
            pl.BlockSpec((None, q_len, NUM_HEADS * kv_len), lambda bi: (bi, 0, 0)),
        ],
        out_shape=[
            jax.ShapeDtypeStruct((b, q_len, hidden), hidden_states.dtype),
            jax.ShapeDtypeStruct((b, q_len, NUM_HEADS * kv_len), jnp.float32),
        ],
        compiler_params=pltpu.CompilerParams(dimension_semantics=("parallel",)),
    )(hidden_states, cross_attention_states, attention_mask,
      kparams["w_q"], kparams["w_kv"], kparams["w_o"],
      kparams["q_norm_w"], kparams["k_norm_w"])

    # unpack lane-dense (B, Q, nH*KV) -> (B, nH, Q, KV)
    attn_weights = aw_packed.reshape(b, q_len, NUM_HEADS, kv_len).transpose(0, 2, 1, 3)
    return out, attn_weights


# -------------------- pure-JAX reference (for sanity) --------------------
def _reference(params, hs, xs, mask):
    def rms(x, w):
        var = jnp.mean(x.astype(jnp.float32) ** 2, axis=-1, keepdims=True)
        return w * (x * jax.lax.rsqrt(var + RMS_EPS))

    b, q_len, hidden = hs.shape
    kv_len = xs.shape[1]
    q = (hs @ params["q_proj"].T).reshape(b, q_len, NUM_HEADS, HEAD_DIM).transpose(0, 2, 1, 3)
    k = (xs @ params["k_proj"].T).reshape(b, kv_len, NUM_KV_HEADS, HEAD_DIM).transpose(0, 2, 1, 3)
    v = (xs @ params["v_proj"].T).reshape(b, kv_len, NUM_KV_HEADS, HEAD_DIM).transpose(0, 2, 1, 3)
    q = rms(q, params["q_norm_w"])
    k = rms(k, params["k_norm_w"])
    k = jnp.repeat(k, NUM_KV_GROUPS, axis=1)
    v = jnp.repeat(v, NUM_KV_GROUPS, axis=1)
    s = jnp.einsum("bhqd,bhkd->bhqk", q, k) * SCALING + mask
    p = jax.nn.softmax(s.astype(jnp.float32), axis=-1)
    o = jnp.einsum("bhqk,bhkd->bhqd", p, v)
    o = o.transpose(0, 2, 1, 3).reshape(b, q_len, NUM_HEADS * HEAD_DIM)
    return o @ params["o_proj"].T, p


# -------------------- main --------------------
if __name__ == "__main__":
    key = jax.random.PRNGKey(0)
    keys = jax.random.split(key, 8)

    scale = 0.05
    params = {
        "q_proj": scale * jax.random.normal(keys[0], (NUM_HEADS * HEAD_DIM, HIDDEN), jnp.float32),
        "k_proj": scale * jax.random.normal(keys[1], (NUM_KV_HEADS * HEAD_DIM, HIDDEN), jnp.float32),
        "v_proj": scale * jax.random.normal(keys[2], (NUM_KV_HEADS * HEAD_DIM, HIDDEN), jnp.float32),
        "o_proj": scale * jax.random.normal(keys[3], (HIDDEN, NUM_HEADS * HEAD_DIM), jnp.float32),
        "q_norm_w": jnp.ones((HEAD_DIM,), jnp.float32) + 0.1 * jax.random.normal(keys[4], (HEAD_DIM,), jnp.float32),
        "k_norm_w": jnp.ones((HEAD_DIM,), jnp.float32) + 0.1 * jax.random.normal(keys[5], (HEAD_DIM,), jnp.float32),
    }
    kparams = prepare_kernel_params(params)

    hidden_states = jax.random.normal(keys[6], (BATCH, Q_LEN, HIDDEN), jnp.float32)
    cross_states = jax.random.normal(keys[7], (BATCH, KV_LEN, HIDDEN), jnp.float32)
    # additive attention mask: mask out the last 4 KV positions for batch 1
    mask = jnp.zeros((BATCH, 1, Q_LEN, KV_LEN), jnp.float32)
    mask = mask.at[1, :, :, -4:].set(-1e9)

    out, attn_w = mllama_text_cross_attention(kparams, hidden_states, cross_states, mask)
    out = jax.block_until_ready(out)
    attn_w = jax.block_until_ready(attn_w)

    ref_out, ref_w = _reference(params, hidden_states, cross_states, mask)
    assert out.shape == (BATCH, Q_LEN, HIDDEN)
    assert attn_w.shape == (BATCH, NUM_HEADS, Q_LEN, KV_LEN)
    assert jnp.allclose(out, ref_out, atol=1e-4, rtol=1e-4)
    assert jnp.allclose(attn_w, ref_w, atol=1e-5, rtol=1e-5)

    print("KERNEL_OK")
</pallas_src>

<mosaic_0001>
module attributes {stable_mosaic.version = 11 : i64} {
  func.func @_fused_cross_attn_kernel(%arg0: i32, %arg1: memref<1x8x64xf32, #tpu.memory_space<vmem>>, %arg2: memref<1x16x64xf32, #tpu.memory_space<vmem>>, %arg3: memref<1x1x8x16xf32, #tpu.memory_space<vmem>>, %arg4: memref<64x64xf32, #tpu.memory_space<vmem>>, %arg5: memref<64x64xf32, #tpu.memory_space<vmem>>, %arg6: memref<64x64xf32, #tpu.memory_space<vmem>>, %arg7: memref<1x16xf32, #tpu.memory_space<vmem>>, %arg8: memref<1x16xf32, #tpu.memory_space<vmem>>, %arg9: memref<1x8x64xf32, #tpu.memory_space<vmem>>, %arg10: memref<1x8x64xf32, #tpu.memory_space<vmem>>) attributes {dimension_semantics = [#tpu.dimension_semantics<parallel>], iteration_bounds = array<i64: 2>, scalar_prefetch = 0 : i64, scratch_operands = 0 : i64, tpu.core_type = #tpu.core_type<tc>, window_params = [{transform_indices = @transform_0, window_bounds = array<i64: 1, 8, 64>}, {transform_indices = @transform_1, window_bounds = array<i64: 1, 16, 64>}, {transform_indices = @transform_2, window_bounds = array<i64: 1, 1, 8, 16>}, {pipeline_mode = #tpu.pipeline_mode<synchronous>, transform_indices = @transform_3, window_bounds = array<i64: 64, 64>}, {pipeline_mode = #tpu.pipeline_mode<synchronous>, transform_indices = @transform_4, window_bounds = array<i64: 64, 64>}, {pipeline_mode = #tpu.pipeline_mode<synchronous>, transform_indices = @transform_5, window_bounds = array<i64: 64, 64>}, {pipeline_mode = #tpu.pipeline_mode<synchronous>, transform_indices = @transform_6, window_bounds = array<i64: 1, 16>}, {pipeline_mode = #tpu.pipeline_mode<synchronous>, transform_indices = @transform_7, window_bounds = array<i64: 1, 16>}, {transform_indices = @transform_8, window_bounds = array<i64: 1, 8, 64>}, {transform_indices = @transform_9, window_bounds = array<i64: 1, 8, 64>}]} {
    %c0 = arith.constant 0 : index
    %c0_0 = arith.constant 0 : index
    %c0_1 = arith.constant 0 : index
    %0 = vector.load %arg1[%c0, %c0_0, %c0_1] : memref<1x8x64xf32, #tpu.memory_space<vmem>>, vector<1x8x64xf32>
    %1 = vector.shape_cast %0 : vector<1x8x64xf32> to vector<8x64xf32>
    %c0_2 = arith.constant 0 : index
    %c0_3 = arith.constant 0 : index
    %c0_4 = arith.constant 0 : index
    %2 = vector.load %arg2[%c0_2, %c0_3, %c0_4] : memref<1x16x64xf32, #tpu.memory_space<vmem>>, vector<1x16x64xf32>
    %3 = vector.shape_cast %2 : vector<1x16x64xf32> to vector<16x64xf32>
    %c0_5 = arith.constant 0 : index
    %c0_6 = arith.constant 0 : index
    %c0_7 = arith.constant 0 : index
    %c0_8 = arith.constant 0 : index
    %4 = vector.load %arg3[%c0_5, %c0_6, %c0_7, %c0_8] : memref<1x1x8x16xf32, #tpu.memory_space<vmem>>, vector<1x1x8x16xf32>
    %5 = vector.shape_cast %4 : vector<1x1x8x16xf32> to vector<8x16xf32>
    %c0_9 = arith.constant 0 : index
    %c0_10 = arith.constant 0 : index
    %6 = vector.load %arg4[%c0_9, %c0_10] : memref<64x64xf32, #tpu.memory_space<vmem>>, vector<64x64xf32>
    %cst = arith.constant dense<0.000000e+00> : vector<8x64xf32>
    %7 = tpu.matmul %1, %6, %cst {dimension_numbers = #tpu.dot_dimension_numbers<[1], [1], [0], [0], [0, 0, 1, 0], [], []>} : vector<8x64xf32>, vector<64x64xf32>, vector<8x64xf32> -> vector<8x64xf32>
    %c0_11 = arith.constant 0 : index
    %c0_12 = arith.constant 0 : index
    %8 = vector.load %arg5[%c0_11, %c0_12] : memref<64x64xf32, #tpu.memory_space<vmem>>, vector<64x64xf32>
    %cst_13 = arith.constant dense<0.000000e+00> : vector<16x64xf32>
    %9 = tpu.matmul %3, %8, %cst_13 {dimension_numbers = #tpu.dot_dimension_numbers<[1], [1], [0], [0], [0, 0, 1, 0], [], []>} : vector<16x64xf32>, vector<64x64xf32>, vector<16x64xf32> -> vector<16x64xf32>
    %10 = vector.extract_strided_slice %9 {offsets = [0, 0], sizes = [16, 32], strides = [1, 1]} : vector<16x64xf32> to vector<16x32xf32>
    %11 = vector.extract_strided_slice %9 {offsets = [0, 32], sizes = [16, 32], strides = [1, 1]} : vector<16x64xf32> to vector<16x32xf32>
    %c0_14 = arith.constant 0 : index
    %c0_15 = arith.constant 0 : index
    %12 = vector.load %arg7[%c0_14, %c0_15] : memref<1x16xf32, #tpu.memory_space<vmem>>, vector<1x16xf32>
    %c0_16 = arith.constant 0 : index
    %c0_17 = arith.constant 0 : index
    %13 = vector.load %arg8[%c0_16, %c0_17] : memref<1x16xf32, #tpu.memory_space<vmem>>, vector<1x16xf32>
    %14 = tpu.concatenate %5, %5 in 0 : vector<8x16xf32>, vector<8x16xf32> -> vector<16x16xf32>
    %15 = vector.extract_strided_slice %10 {offsets = [0, 0], sizes = [16, 16], strides = [1, 1]} : vector<16x32xf32> to vector<16x16xf32>
    %16 = arith.mulf %15, %15 : vector<16x16xf32>
    %cst_18 = arith.constant dense<0.000000e+00> : vector<16xf32>
    %17 = vector.multi_reduction <add>, %16, %cst_18 [1] : vector<16x16xf32> to vector<16xf32>
    %18 = vector.shape_cast %17 : vector<16xf32> to vector<16x1xf32>
    %cst_19 = arith.constant 1.600000e+01 : f32
    %19 = vector.broadcast %cst_19 : f32 to vector<16x1xf32>
    %20 = arith.divf %18, %19 : vector<16x1xf32>
    %cst_20 = arith.constant 9.99999997E-7 : f32
    %21 = vector.broadcast %cst_20 : f32 to vector<16x1xf32>
    %22 = arith.addf %20, %21 : vector<16x1xf32>
    %23 = math.rsqrt %22 : vector<16x1xf32>
    %24 = vector.broadcast %23 : vector<16x1xf32> to vector<16x16xf32>
    %25 = arith.mulf %15, %24 : vector<16x16xf32>
    %26 = vector.broadcast %13 : vector<1x16xf32> to vector<16x16xf32>
    %27 = arith.mulf %25, %26 : vector<16x16xf32>
    %28 = vector.extract_strided_slice %11 {offsets = [0, 0], sizes = [16, 16], strides = [1, 1]} : vector<16x32xf32> to vector<16x16xf32>
    %29 = vector.extract_strided_slice %7 {offsets = [0, 0], sizes = [8, 16], strides = [1, 1]} : vector<8x64xf32> to vector<8x16xf32>
    %30 = arith.mulf %29, %29 : vector<8x16xf32>
    %cst_21 = arith.constant dense<0.000000e+00> : vector<8xf32>
    %31 = vector.multi_reduction <add>, %30, %cst_21 [1] : vector<8x16xf32> to vector<8xf32>
    %32 = vector.shape_cast %31 : vector<8xf32> to vector<8x1xf32>
    %cst_22 = arith.constant 1.600000e+01 : f32
    %33 = vector.broadcast %cst_22 : f32 to vector<8x1xf32>
    %34 = arith.divf %32, %33 : vector<8x1xf32>
    %cst_23 = arith.constant 9.99999997E-7 : f32
    %35 = vector.broadcast %cst_23 : f32 to vector<8x1xf32>
    %36 = arith.addf %34, %35 : vector<8x1xf32>
    %37 = math.rsqrt %36 : vector<8x1xf32>
    %38 = vector.broadcast %37 : vector<8x1xf32> to vector<8x16xf32>
    %39 = arith.mulf %29, %38 : vector<8x16xf32>
    %40 = vector.broadcast %12 : vector<1x16xf32> to vector<8x16xf32>
    %41 = arith.mulf %39, %40 : vector<8x16xf32>
    %42 = vector.extract_strided_slice %7 {offsets = [0, 16], sizes = [8, 16], strides = [1, 1]} : vector<8x64xf32> to vector<8x16xf32>
    %43 = arith.mulf %42, %42 : vector<8x16xf32>
    %cst_24 = arith.constant dense<0.000000e+00> : vector<8xf32>
    %44 = vector.multi_reduction <add>, %43, %cst_24 [1] : vector<8x16xf32> to vector<8xf32>
    %45 = vector.shape_cast %44 : vector<8xf32> to vector<8x1xf32>
    %cst_25 = arith.constant 1.600000e+01 : f32
    %46 = vector.broadcast %cst_25 : f32 to vector<8x1xf32>
    %47 = arith.divf %45, %46 : vector<8x1xf32>
    %cst_26 = arith.constant 9.99999997E-7 : f32
    %48 = vector.broadcast %cst_26 : f32 to vector<8x1xf32>
    %49 = arith.addf %47, %48 : vector<8x1xf32>
    %50 = math.rsqrt %49 : vector<8x1xf32>
    %51 = vector.broadcast %50 : vector<8x1xf32> to vector<8x16xf32>
    %52 = arith.mulf %42, %51 : vector<8x16xf32>
    %53 = vector.broadcast %12 : vector<1x16xf32> to vector<8x16xf32>
    %54 = arith.mulf %52, %53 : vector<8x16xf32>
    %55 = tpu.concatenate %41, %54 in 0 : vector<8x16xf32>, vector<8x16xf32> -> vector<16x16xf32>
    %cst_27 = arith.constant dense<0.000000e+00> : vector<16x16xf32>
    %56 = tpu.matmul %55, %27, %cst_27 {dimension_numbers = #tpu.dot_dimension_numbers<[1], [1], [0], [0], [0, 0, 1, 0], [], []>} : vector<16x16xf32>, vector<16x16xf32>, vector<16x16xf32> -> vector<16x16xf32>
    %cst_28 = arith.constant 2.500000e-01 : f32
    %57 = vector.broadcast %cst_28 : f32 to vector<16x16xf32>
    %58 = arith.mulf %56, %57 : vector<16x16xf32>
    %59 = arith.addf %58, %14 : vector<16x16xf32>
    %cst_29 = arith.constant dense<0xFF800000> : vector<16xf32>
    %60 = vector.multi_reduction <maximumf>, %59, %cst_29 [1] : vector<16x16xf32> to vector<16xf32>
    %61 = vector.shape_cast %60 : vector<16xf32> to vector<16x1xf32>
    %62 = vector.broadcast %61 : vector<16x1xf32> to vector<16x16xf32>
    %63 = arith.subf %59, %62 : vector<16x16xf32>
    %64 = math.exp %63 : vector<16x16xf32>
    %cst_30 = arith.constant dense<0.000000e+00> : vector<16xf32>
    %65 = vector.multi_reduction <add>, %64, %cst_30 [1] : vector<16x16xf32> to vector<16xf32>
    %66 = vector.shape_cast %65 : vector<16xf32> to vector<16x1xf32>
    %67 = vector.broadcast %66 : vector<16x1xf32> to vector<16x16xf32>
    %68 = arith.divf %64, %67 : vector<16x16xf32>
    %cst_31 = arith.constant dense<0.000000e+00> : vector<16x16xf32>
    %69 = tpu.matmul %68, %28, %cst_31 {dimension_numbers = #tpu.dot_dimension_numbers<[1], [0], [0], [1], [0, 0, 1, 1], [], []>} : vector<16x16xf32>, vector<16x16xf32>, vector<16x16xf32> -> vector<16x16xf32>
    %70 = vector.extract_strided_slice %69 {offsets = [0, 0], sizes = [8, 16], strides = [1, 1]} : vector<16x16xf32> to vector<8x16xf32>
    %71 = vector.extract_strided_slice %68 {offsets = [0, 0], sizes = [8, 16], strides = [1, 1]} : vector<16x16xf32> to vector<8x16xf32>
    %72 = vector.extract_strided_slice %69 {offsets = [8, 0], sizes = [8, 16], strides = [1, 1]} : vector<16x16xf32> to vector<8x16xf32>
    %73 = vector.extract_strided_slice %68 {offsets = [8, 0], sizes = [8, 16], strides = [1, 1]} : vector<16x16xf32> to vector<8x16xf32>
    %74 = vector.extract_strided_slice %10 {offsets = [0, 16], sizes = [16, 16], strides = [1, 1]} : vector<16x32xf32> to vector<16x16xf32>
    %75 = arith.mulf %74, %74 : vector<16x16xf32>
    %cst_32 = arith.constant dense<0.000000e+00> : vector<16xf32>
    %76 = vector.multi_reduction <add>, %75, %cst_32 [1] : vector<16x16xf32> to vector<16xf32>
    %77 = vector.shape_cast %76 : vector<16xf32> to vector<16x1xf32>
    %cst_33 = arith.constant 1.600000e+01 : f32
    %78 = vector.broadcast %cst_33 : f32 to vector<16x1xf32>
    %79 = arith.divf %77, %78 : vector<16x1xf32>
    %cst_34 = arith.constant 9.99999997E-7 : f32
    %80 = vector.broadcast %cst_34 : f32 to vector<16x1xf32>
    %81 = arith.addf %79, %80 : vector<16x1xf32>
    %82 = math.rsqrt %81 : vector<16x1xf32>
    %83 = vector.broadcast %82 : vector<16x1xf32> to vector<16x16xf32>
    %84 = arith.mulf %74, %83 : vector<16x16xf32>
    %85 = vector.broadcast %13 : vector<1x16xf32> to vector<16x16xf32>
    %86 = arith.mulf %84, %85 : vector<16x16xf32>
    %87 = vector.extract_strided_slice %11 {offsets = [0, 16], sizes = [16, 16], strides = [1, 1]} : vector<16x32xf32> to vector<16x16xf32>
    %88 = vector.extract_strided_slice %7 {offsets = [0, 32], sizes = [8, 16], strides = [1, 1]} : vector<8x64xf32> to vector<8x16xf32>
    %89 = arith.mulf %88, %88 : vector<8x16xf32>
    %cst_35 = arith.constant dense<0.000000e+00> : vector<8xf32>
    %90 = vector.multi_reduction <add>, %89, %cst_35 [1] : vector<8x16xf32> to vector<8xf32>
    %91 = vector.shape_cast %90 : vector<8xf32> to vector<8x1xf32>
    %cst_36 = arith.constant 1.600000e+01 : f32
    %92 = vector.broadcast %cst_36 : f32 to vector<8x1xf32>
    %93 = arith.divf %91, %92 : vector<8x1xf32>
    %cst_37 = arith.constant 9.99999997E-7 : f32
    %94 = vector.broadcast %cst_37 : f32 to vector<8x1xf32>
    %95 = arith.addf %93, %94 : vector<8x1xf32>
    %96 = math.rsqrt %95 : vector<8x1xf32>
    %97 = vector.broadcast %96 : vector<8x1xf32> to vector<8x16xf32>
    %98 = arith.mulf %88, %97 : vector<8x16xf32>
    %99 = vector.broadcast %12 : vector<1x16xf32> to vector<8x16xf32>
    %100 = arith.mulf %98, %99 : vector<8x16xf32>
    %101 = vector.extract_strided_slice %7 {offsets = [0, 48], sizes = [8, 16], strides = [1, 1]} : vector<8x64xf32> to vector<8x16xf32>
    %102 = arith.mulf %101, %101 : vector<8x16xf32>
    %cst_38 = arith.constant dense<0.000000e+00> : vector<8xf32>
    %103 = vector.multi_reduction <add>, %102, %cst_38 [1] : vector<8x16xf32> to vector<8xf32>
    %104 = vector.shape_cast %103 : vector<8xf32> to vector<8x1xf32>
    %cst_39 = arith.constant 1.600000e+01 : f32
    %105 = vector.broadcast %cst_39 : f32 to vector<8x1xf32>
    %106 = arith.divf %104, %105 : vector<8x1xf32>
    %cst_40 = arith.constant 9.99999997E-7 : f32
    %107 = vector.broadcast %cst_40 : f32 to vector<8x1xf32>
    %108 = arith.addf %106, %107 : vector<8x1xf32>
    %109 = math.rsqrt %108 : vector<8x1xf32>
    %110 = vector.broadcast %109 : vector<8x1xf32> to vector<8x16xf32>
    %111 = arith.mulf %101, %110 : vector<8x16xf32>
    %112 = vector.broadcast %12 : vector<1x16xf32> to vector<8x16xf32>
    %113 = arith.mulf %111, %112 : vector<8x16xf32>
    %114 = tpu.concatenate %100, %113 in 0 : vector<8x16xf32>, vector<8x16xf32> -> vector<16x16xf32>
    %cst_41 = arith.constant dense<0.000000e+00> : vector<16x16xf32>
    %115 = tpu.matmul %114, %86, %cst_41 {dimension_numbers = #tpu.dot_dimension_numbers<[1], [1], [0], [0], [0, 0, 1, 0], [], []>} : vector<16x16xf32>, vector<16x16xf32>, vector<16x16xf32> -> vector<16x16xf32>
    %cst_42 = arith.constant 2.500000e-01 : f32
    %116 = vector.broadcast %cst_42 : f32 to vector<16x16xf32>
    %117 = arith.mulf %115, %116 : vector<16x16xf32>
    %118 = arith.addf %117, %14 : vector<16x16xf32>
    %cst_43 = arith.constant dense<0xFF800000> : vector<16xf32>
    %119 = vector.multi_reduction <maximumf>, %118, %cst_43 [1] : vector<16x16xf32> to vector<16xf32>
    %120 = vector.shape_cast %119 : vector<16xf32> to vector<16x1xf32>
    %121 = vector.broadcast %120 : vector<16x1xf32> to vector<16x16xf32>
    %122 = arith.subf %118, %121 : vector<16x16xf32>
    %123 = math.exp %122 : vector<16x16xf32>
    %cst_44 = arith.constant dense<0.000000e+00> : vector<16xf32>
    %124 = vector.multi_reduction <add>, %123, %cst_44 [1] : vector<16x16xf32> to vector<16xf32>
    %125 = vector.shape_cast %124 : vector<16xf32> to vector<16x1xf32>
    %126 = vector.broadcast %125 : vector<16x1xf32> to vector<16x16xf32>
    %127 = arith.divf %123, %126 : vector<16x16xf32>
    %cst_45 = arith.constant dense<0.000000e+00> : vector<16x16xf32>
    %128 = tpu.matmul %127, %87, %cst_45 {dimension_numbers = #tpu.dot_dimension_numbers<[1], [0], [0], [1], [0, 0, 1, 1], [], []>} : vector<16x16xf32>, vector<16x16xf32>, vector<16x16xf32> -> vector<16x16xf32>
    %129 = vector.extract_strided_slice %128 {offsets = [0, 0], sizes = [8, 16], strides = [1, 1]} : vector<16x16xf32> to vector<8x16xf32>
    %130 = vector.extract_strided_slice %127 {offsets = [0, 0], sizes = [8, 16], strides = [1, 1]} : vector<16x16xf32> to vector<8x16xf32>
    %131 = vector.extract_strided_slice %128 {offsets = [8, 0], sizes = [8, 16], strides = [1, 1]} : vector<16x16xf32> to vector<8x16xf32>
    %132 = vector.extract_strided_slice %127 {offsets = [8, 0], sizes = [8, 16], strides = [1, 1]} : vector<16x16xf32> to vector<8x16xf32>
    %133 = tpu.concatenate %70, %72, %129, %131 in 1 : vector<8x16xf32>, vector<8x16xf32>, vector<8x16xf32>, vector<8x16xf32> -> vector<8x64xf32>
    %134 = tpu.concatenate %71, %73, %130, %132 in 1 : vector<8x16xf32>, vector<8x16xf32>, vector<8x16xf32>, vector<8x16xf32> -> vector<8x64xf32>
    %c0_46 = arith.constant 0 : index
    %c0_47 = arith.constant 0 : index
    %c0_48 = arith.constant 0 : index
    %135 = vector.load %arg10[%c0_46, %c0_47, %c0_48] : memref<1x8x64xf32, #tpu.memory_space<vmem>>, vector<1x8x64xf32>
    %136 = vector.shape_cast %135 : vector<1x8x64xf32> to vector<8x64xf32>
    %137 = vector.shape_cast %134 : vector<8x64xf32> to vector<1x8x64xf32>
    tpu.vector_store %arg10[%c0_46, %c0_47, %c0_48], %137 {strides = array<i32>} : memref<1x8x64xf32, #tpu.memory_space<vmem>>, vector<1x8x64xf32>,
    %c0_49 = arith.constant 0 : index
    %c0_50 = arith.constant 0 : index
    %138 = vector.load %arg6[%c0_49, %c0_50] : memref<64x64xf32, #tpu.memory_space<vmem>>, vector<64x64xf32>
    %cst_51 = arith.constant dense<0.000000e+00> : vector<8x64xf32>
    %139 = tpu.matmul %133, %138, %cst_51 {dimension_numbers = #tpu.dot_dimension_numbers<[1], [1], [0], [0], [0, 0, 1, 0], [], []>} : vector<8x64xf32>, vector<64x64xf32>, vector<8x64xf32> -> vector<8x64xf32>
    %c0_52 = arith.constant 0 : index
    %c0_53 = arith.constant 0 : index
    %c0_54 = arith.constant 0 : index
    %140 = vector.load %arg9[%c0_52, %c0_53, %c0_54] : memref<1x8x64xf32, #tpu.memory_space<vmem>>, vector<1x8x64xf32>
    %141 = vector.shape_cast %140 : vector<1x8x64xf32> to vector<8x64xf32>
    %142 = vector.shape_cast %139 : vector<8x64xf32> to vector<1x8x64xf32>
    tpu.vector_store %arg9[%c0_52, %c0_53, %c0_54], %142 {strides = array<i32>} : memref<1x8x64xf32, #tpu.memory_space<vmem>>, vector<1x8x64xf32>,
    return
  }
  func.func @transform_0(%arg0: i32) -> (i32, i32, i32) {
    %c0_i32 = arith.constant 0 : i32
    %c0_i32_0 = arith.constant 0 : i32
    %c0_i32_1 = arith.constant 0 : i32
    return %arg0, %c0_i32, %c0_i32_0 : i32, i32, i32
  }
  func.func @transform_1(%arg0: i32) -> (i32, i32, i32) {
    %c0_i32 = arith.constant 0 : i32
    %c0_i32_0 = arith.constant 0 : i32
    %c0_i32_1 = arith.constant 0 : i32
    return %arg0, %c0_i32, %c0_i32_0 : i32, i32, i32
  }
  func.func @transform_2(%arg0: i32) -> (i32, i32, i32, i32) {
    %c0_i32 = arith.constant 0 : i32
    %c0_i32_0 = arith.constant 0 : i32
    %c0_i32_1 = arith.constant 0 : i32
    %c0_i32_2 = arith.constant 0 : i32
    return %arg0, %c0_i32, %c0_i32_0, %c0_i32_1 : i32, i32, i32, i32
  }
  func.func @transform_3(%arg0: i32) -> (i32, i32) {
    %c0_i32 = arith.constant 0 : i32
    %c0_i32_0 = arith.constant 0 : i32
    %c0_i32_1 = arith.constant 0 : i32
    return %c0_i32, %c0_i32_0 : i32, i32
  }
  func.func @transform_4(%arg0: i32) -> (i32, i32) {
    %c0_i32 = arith.constant 0 : i32
    %c0_i32_0 = arith.constant 0 : i32
    %c0_i32_1 = arith.constant 0 : i32
    return %c0_i32, %c0_i32_0 : i32, i32
  }
  func.func @transform_5(%arg0: i32) -> (i32, i32) {
    %c0_i32 = arith.constant 0 : i32
    %c0_i32_0 = arith.constant 0 : i32
    %c0_i32_1 = arith.constant 0 : i32
    return %c0_i32, %c0_i32_0 : i32, i32
  }
  func.func @transform_6(%arg0: i32) -> (i32, i32) {
    %c0_i32 = arith.constant 0 : i32
    %c0_i32_0 = arith.constant 0 : i32
    %c0_i32_1 = arith.constant 0 : i32
    return %c0_i32, %c0_i32_0 : i32, i32
  }
  func.func @transform_7(%arg0: i32) -> (i32, i32) {
    %c0_i32 = arith.constant 0 : i32
    %c0_i32_0 = arith.constant 0 : i32
    %c0_i32_1 = arith.constant 0 : i32
    return %c0_i32, %c0_i32_0 : i32, i32
  }
  func.func @transform_8(%arg0: i32) -> (i32, i32, i32) {
    %c0_i32 = arith.constant 0 : i32
    %c0_i32_0 = arith.constant 0 : i32
    %c0_i32_1 = arith.constant 0 : i32
    return %arg0, %c0_i32, %c0_i32_0 : i32, i32, i32
  }
  func.func @transform_9(%arg0: i32) -> (i32, i32, i32) {
    %c0_i32 = arith.constant 0 : i32
    %c0_i32_0 = arith.constant 0 : i32
    %c0_i32_1 = arith.constant 0 : i32
    return %arg0, %c0_i32, %c0_i32_0 : i32, i32, i32
  }
}

</mosaic_0001>

<bundles_post_ra>
// kernel: tpu_custom_call.1
= control target key start
LH: loop header
LB: loop body
LE: loop exit
PB: predicated region body
PF: predicated region fallthrough
CT: control target
= control target key end

     0   :  { %s2734_s0 = inlined_call_operand.hbm [shape: f32[2,8,64], index: 0, kind: input, shape index: {}]   ;;  %s2735_s1 = inlined_call_operand.hbm [shape: f32[2,16,64], index: 1, kind: input, shape index: {}]   ;;  %s2736_s2 = inlined_call_operand.hbm [shape: f32[2,1,8,16], index: 2, kind: input, shape index: {}]   ;;  %s2737_s3 = inlined_call_operand.hbm [shape: f32[64,64], index: 3, kind: input, shape index: {}]   ;;  %s2738_s4 = inlined_call_operand.hbm [shape: f32[64,64], index: 4, kind: input, shape index: {}]   ;;  %s2739_s5 = inlined_call_operand.hbm [shape: f32[64,64], index: 5, kind: input, shape index: {}]   ;;  %s2740_s6 = inlined_call_operand.vmem [shape: f32[1,16], index: 6, kind: input, shape index: {}]   ;;  %s2741_s7 = inlined_call_operand.vmem [shape: f32[1,16], index: 7, kind: input, shape index: {}]   ;;  %s2742_s8 = inlined_call_operand.hbm [shape: f32[2,8,64], index: 8, kind: output, shape index: {0}]   ;;  %s2743_s9 = inlined_call_operand.hbm [shape: f32[2,8,64], index: 9, kind: output, shape index: {1}]  }
   0x1   :  { %2759 = sst [smem:[#allocation27_spill]] %s2735_s1 }
   0x2   :  { %2760 = sst [smem:[#allocation28_spill]] %s2737_s3 }
   0x3   :  { %2761 = sst [smem:[#allocation29_spill]] %s2738_s4 }
   0x4   :  { %2762 = sst [smem:[#allocation30_spill]] %s2742_s8 }
   0x5   :  { %15 = vsyncpa [#allocation3], 0 }
   0x6   :  { %17 = vsyncpa [#allocation3 + $0x1], 0 }
   0x7   :  { %18 = vsyncpa [#allocation6], 0 }
   0x8   :  { %20 = vsyncpa [#allocation6 + $0x1], 0 }
   0x9   :  { %21 = vsyncpa [#allocation9], 0 }
   0xa   :  { %22 = vsyncpa [#allocation12], 0 }
   0xb   :  { %23 = vsyncpa [#allocation4], 0 }
   0xc   :  { %25 = vsyncpa [#allocation4 + $0x1], 0 }
   0xd   :  { %26 = vsyncpa [#allocation15], 0 }
   0xe   :  { %28 = vsyncpa [#allocation15 + $0x1], 0  ;;  %s2241_s30 = smov 0   ;;  %s2243_s10 = smov 0  }
   0xf   :  { %s2245_s11 = smov 0   ;;  %s2247_s12 = smov 0  }
  0x10 LB: > { %2763 = sst [smem:[#allocation22_spill]] %s2159_s30  ;;  %s2262_s13 = sadd.s32 4294967295, %s2171_s12   ;;  %s2171_s12 = sphi %s2247_s12, %s2795_s12   ;;  %s2167_s11 = sphi %s2245_s11, %s2797_s11   ;;  %s2163_s10 = sphi %s2243_s10, %s2799_s10   ;;  %s2159_s30 = sphi %s2241_s30, %s2798_s30  }
  0x11   : > { %2764 = sst [smem:[#allocation23_spill]] %s2167_s11  ;;  %s1569_s14 = sadd.s32 4294967294, %s2171_s12  }
  0x12   : > { %s2266_s15 = sadd.s32 1, %s2171_s12   ;;  %s41_s16 = sadd.s32 1, %s2167_s11 }
  0x13   : > { %2765 = sst [smem:[#allocation24_spill]] %s2266_s15  ;;  %s38_s17 = ssub.s32 %s2171_s12, %s2266_s15 }
  0x14   : > { %p48_p0 = scmp.ne.s32.totalorder %s2167_s11, %s2163_s10  ;;  %p39_p1 = scmp.eq.s32.totalorder %s38_s17, 0 }
  0x15   : > { %p49_p2 = scmp.eq.s32.totalorder %s2171_s12, 0  ;;  %p54_p3 = scmp.ne.s32.totalorder %s2163_s10, %s2159_s30 }
  0x16   : > { %p2744_p4 = scmp.eq.s32.totalorder %s2262_s13, 0  ;;  %p235_p7 = scmp.eq.s32.totalorder %s2262_s13, 1 }
  0x17   : > { %s2278_s18 = scalar_select %p39_p1, %s2167_s11, %s41_s16  }
  0x18   : > { %p2280_p5 = por %p49_p2, %p48_p0  ;;  %p2286_p6 = por %p2744_p4, %p54_p3 }
  0x19   : > { %2766 = sst [smem:[#allocation25_spill]] %s2278_s18  ;;  %p241_p8 = scmp.eq.s32.totalorder %s1569_s14, 1 }
  0x1a   : > { %s2768_s20 = scalar_select %p2286_p6, 1, 0 }
  0x1b   : > { %p1570_p9 = scmp.ge.s32.totalorder %s2171_s12, 1  ;;  %p274_p10 = scmp.lt.s32.totalorder %s2171_s12, 3 }
  0x1c   : > { %p2293_p11 = por %p235_p7, %p48_p0  ;;  %p2297_p12 = por %p241_p8, %p54_p3 }
  0x1d   : > { %p2301_p13 = pnand %p1570_p9, %p274_p10  ;;  %s2173_s24 = smov [#allocation8]  }
  0x1e   : > { %s2769_s21 = scalar_select %p2293_p11, 1, 0 }
  0x1f   : > { %s2770_s22 = scalar_select %p2297_p12, 1, 0 }
  0x20   : > { %s2772_s23 = scalar_select %p2301_p13, 1, 0 }
  0x21   : > { %2771 = sst [smem:[#allocation26_spill]] %s2770_s22  ;;  %p1791_p1 = pneg %p2301_p13 }
  0x22   : > { %s286_s25 = sshll.u32 %s2173_s24, 4  ;;  %p1821_p3 = scmp.lt.s32.totalorder %s2171_s12, 2  ;;  %s287_s25 = int_to_ptr.vmem [resolvable:$true] %s286_s25 }
  0x23   : > { %p2309_p2 = pnand %p1791_p1, %p2744_p4  ;;  %s2316_s27 = sand.u32 1, %s2167_s11  }
  0x24   : > { %s350_s28 = sand.u32 1, %s2171_s12   ;;  %s1914_s29 = scalar_lea.vmem %s287_s25, 1024 }
  0x25   : > { %s2773_s26 = scalar_select %p2309_p2, 1, 0 }
  0x26   : > { %p2754_p7 = pneg %p2309_p2  ;;  %p1915_p8 = scmp.ne.s32.totalorder %s287_s25, %s1914_s29 }
  0x27   : > { %p1922_p12 = scmp.lt.s32.totalorder %s287_s25, %s287_s25  ;;  %p1923_p1 = scmp.lt.s32.totalorder %s1914_s29, %s1914_s29 }
  0x28   : > { %p1917_p9 = pnand %p1915_p8, %p2754_p7 }
  0x29   : > { %p1924_p4 = por %p1923_p1, %p1922_p12 }
  0x2a   : > { %p1918_p10 = pneg %p1917_p9 }
  0x2c   : > { %p1925_p11 = pnand %p1924_p4, %p1918_p10 }
  0x2e   : > { %1928 = shalt.err (!%p1925_p11)
}
  0x2f   : > { %s2752_s14 = smov 128   ;;  %s2175_s16 = smov 8  }
  0x30   : > { %s2774_s3 = sld [smem:[#allocation28_spill]]  ;;  %p2336_p12 = pnand %p1821_p3, %p2280_p5 }
  0x31   : > { %s1577_s18 = sshll.u32 %s2316_s27, 4  ;;  %s1639_s11 = sshll.u32 %s2171_s12, 8 }
  0x32   : > { %s2776_s1 = sld [smem:[#allocation27_spill]]  ;;  %s354_s8 = scalar_lea.vmem [#allocation5], %s1577_s18 }
  0x33   : > { %s361_s17 = sshll.u32 %s354_s8, 4  ;;  %s2349_s19 = scalar_lea.sflag [#allocation6], %s350_s28  ;;  %s2347_s17 = int_to_ptr.vmem [resolvable:$true] %s361_s17 }
  0x34   : > { %p2355_p5 = pneg %p2336_p12 }
  0x36   : > { %1794 = dma.hbm_to_vmem [thread:$0]  (!%p2309_p2), %s2774_s3, 1024, %s287_s25, [#allocation9], %s2752_s14, %s2752_s14, %s2175_s16  }
  0x38   : > { %s2345_s30 = scalar_lea.hbm %s2776_s1, %s1639_s11  ;;  %s1934_s18 = scalar_lea.hbm %s2776_s1, 512 }
  0x39   : > { %s1929_s25 = scalar_lea.hbm %s2345_s30, 256  ;;  %p1935_p8 = scmp.lt.s32.totalorder %s2345_s30, %s2776_s1 }
  0x3a   : > { %p1930_p4 = scmp.ne.s32.totalorder %s2345_s30, %s1929_s25  ;;  %p1936_p9 = scmp.lt.s32.totalorder %s1934_s18, %s1929_s25 }
  0x3c   : > { %p1932_p11 = pnand %p2355_p5, %p1930_p4  ;;  %p1937_p10 = por %p1936_p9, %p1935_p8 }
  0x3e   : > { %p1933_p3 = pneg %p1932_p11 }
  0x40   : > { %p1938_p1 = pnand %p1937_p10, %p1933_p3 }
  0x42   : > { %1941 = shalt.err (!%p1938_p1)
}
  0x43   : > { %s1942_s28 = scalar_lea.vmem %s2347_s17, 256  ;;  %s2176_s14 = smov [#allocation5]  }
  0x44   : > { %p1943_p0 = scmp.ne.s32.totalorder %s2347_s17, %s1942_s28  ;;  %s1947_s11 = sshll.u32 %s2176_s14, 4  ;;  %s1948_s11 = int_to_ptr.vmem [resolvable:$false] %s1947_s11 }
  0x45   : > { %s1949_s15 = scalar_lea.vmem %s1948_s11, 512  ;;  %p1950_p7 = scmp.lt.s32.totalorder %s2347_s17, %s1948_s11 }
  0x46   : > { %p1945_p4 = pnand %p1943_p0, %p2355_p5  ;;  %p1951_p6 = scmp.lt.s32.totalorder %s1949_s15, %s1942_s28 }
  0x48   : > { %p1946_p11 = pneg %p1945_p4  ;;  %p1952_p13 = por %p1951_p6, %p1950_p7 }
  0x4a   : > { %p1953_p2 = pnand %p1952_p13, %p1946_p11 }
  0x4c   : > { %1956 = shalt.err (!%p1953_p2)
}
  0x4d   : > { %s2778_s25 = smov 128   ;;  %s2177_s18 = smov [#allocation10]  }
  0x4e   : > { %1807 = dma.hbm_to_vmem [thread:$0]  (!%p2336_p12), %s2345_s30, 256, %s2347_s17, %s2349_s19, %s2778_s25, %s2778_s25, %s2175_s16  }
  0x4f   : > { %s299_s8 = sshll.u32 %s2177_s18, 4  ;;  %s2178_s14 = smov [#allocation11]   ;;  %s300_s8 = int_to_ptr.vmem [resolvable:$true] %s299_s8 }
  0x50   : > { %s312_s22 = sshll.u32 %s2178_s14, 4  ;;  %s1968_s11 = scalar_lea.vmem %s300_s8, 1024  ;;  %s313_s22 = int_to_ptr.vmem [resolvable:$true] %s312_s22 }
  0x51   : > { %p1969_p0 = scmp.ne.s32.totalorder %s300_s8, %s1968_s11  ;;  %p2779_p6 = scmp.ne.s32.totalorder %s2773_s26, 0 }
  0x52   : > { %p1976_p3 = scmp.lt.s32.totalorder %s300_s8, %s300_s8  ;;  %p1977_p8 = scmp.lt.s32.totalorder %s1968_s11, %s1968_s11 }
  0x53   : > { %p2780_p13 = pneg %p2779_p6 }
  0x54   : > { %p1978_p9 = por %p1977_p8, %p1976_p3 }
  0x55   : > { %p1971_p2 = pnand %p1969_p0, %p2780_p13 }
  0x57   : > { %p1972_p7 = pneg %p1971_p2 }
  0x59   : > { %p1979_p10 = pnand %p1978_p9, %p1972_p7 }
  0x5b   : > { %1982 = shalt.err (!%p1979_p10)
}
  0x5c   : > { %s2781_s4 = sld [smem:[#allocation29_spill]]  ;;  %s1994_s28 = scalar_lea.vmem %s313_s22, 1024 }
  0x5d   : > { %p1995_p1 = scmp.ne.s32.totalorder %s313_s22, %s1994_s28  ;;  %p2782_p4 = pmov %p2780_p13 }
  0x5e   : > { %p2002_p13 = scmp.lt.s32.totalorder %s313_s22, %s313_s22  ;;  %p2003_p2 = scmp.lt.s32.totalorder %s1994_s28, %s1994_s28 }
  0x5f   : > { %p1997_p11 = pnand %p1995_p1, %p2782_p4 }
  0x60   : > { %p2004_p7 = por %p2003_p2, %p2002_p13 }
  0x61   : > { %p1998_p0 = pneg %p1997_p11 }
  0x62   : > { %1797 = dma.hbm_to_vmem [thread:$0]  (!%p2779_p6), %s2781_s4, 1024, %s300_s8, [#allocation9], %s2778_s25, %s2778_s25, %s2175_s16  }
  0x63   : > { %p2005_p3 = pnand %p2004_p7, %p1998_p0 }
  0x65   : > { %2008 = shalt.err (!%p2005_p3)
}
  0x66   : > { %1800 = dma.hbm_to_vmem [thread:$0]  (!%p2779_p6), %s2739_s5, 1024, %s313_s22, [#allocation12], %s2778_s25, %s2778_s25, %s2175_s16  }
  0x67   : > { %s1575_s8 = sshll.u32 %s2316_s27, 3  ;;  %s1576_s14 = sshll.u32 %s2171_s12, 7 }
  0x68   : > { %s2408_s17 = scalar_lea.hbm %s2734_s0, %s1576_s14  ;;  %s336_s26 = scalar_lea.vmem [#allocation2], %s1575_s8 }
  0x69   : > { %s343_s28 = sshll.u32 %s336_s26, 4  ;;  %s2415_s1 = scalar_lea.hbm %s2736_s2, %s1576_s14  ;;  %s344_s28 = int_to_ptr.vmem [resolvable:$true] %s343_s28 }
  0x6a   : > { %s333_s16 = scalar_lea.sflag [#allocation3], %s2316_s27  ;;  %s2009_s25 = scalar_lea.hbm %s2408_s17, 128 }
  0x6b   : > { %p2010_p6 = scmp.ne.s32.totalorder %s2408_s17, %s2009_s25  ;;  %s2014_s30 = scalar_lea.hbm %s2734_s0, 256 }
  0x6c   : > { %p2015_p10 = scmp.lt.s32.totalorder %s2408_s17, %s2734_s0  ;;  %p2016_p1 = scmp.lt.s32.totalorder %s2014_s30, %s2009_s25 }
  0x6d   : > { %p2012_p8 = pnand %p2010_p6, %p2355_p5 }
  0x6e   : > { %p2017_p4 = por %p2016_p1, %p2015_p10 }
  0x6f   : > { %p2013_p9 = pneg %p2012_p8 }
  0x71   : > { %p2018_p11 = pnand %p2017_p4, %p2013_p9 }
  0x73   : > { %2021 = shalt.err (!%p2018_p11)
}
  0x74   : > { %s2022_s14 = scalar_lea.vmem %s344_s28, 128  ;;  %s2179_s26 = smov [#allocation2]  }
  0x75   : > { %p2023_p0 = scmp.ne.s32.totalorder %s344_s28, %s2022_s14  ;;  %s2027_s15 = sshll.u32 %s2179_s26, 4  ;;  %s2028_s15 = int_to_ptr.vmem [resolvable:$false] %s2027_s15 }
  0x76   : > { %s2029_s18 = scalar_lea.vmem %s2028_s15, 256  ;;  %p2030_p7 = scmp.lt.s32.totalorder %s344_s28, %s2028_s15 }
  0x77   : > { %p2025_p13 = pnand %p2023_p0, %p2355_p5  ;;  %p2031_p3 = scmp.lt.s32.totalorder %s2029_s18, %s2022_s14 }
  0x79   : > { %p2026_p2 = pneg %p2025_p13  ;;  %p2032_p6 = por %p2031_p3, %p2030_p7 }
  0x7b   : > { %p2033_p8 = pnand %p2032_p6, %p2026_p2 }
  0x7d   : > { %2036 = shalt.err (!%p2033_p8)
}
  0x7e   : > { %1804 = dma.hbm_to_vmem [thread:$0]  (!%p2336_p12), %s2408_s17, 128, %s344_s28, %s333_s16  }
  0x7f   : > { %s375_s3 = scalar_lea.vmem [#allocation7], %s1575_s8  ;;  %s2037_s25 = scalar_lea.hbm %s2415_s1, 128 }
  0x80   : > { %s382_s4 = sshll.u32 %s375_s3, 4  ;;  %p2038_p9 = scmp.ne.s32.totalorder %s2415_s1, %s2037_s25  ;;  %s383_s4 = int_to_ptr.vmem [resolvable:$true] %s382_s4 }
  0x81   : > { %s2042_s30 = scalar_lea.hbm %s2736_s2, 256  ;;  %p2043_p4 = scmp.lt.s32.totalorder %s2415_s1, %s2736_s2 }
  0x82   : > { %p2040_p10 = pnand %p2038_p9, %p2355_p5  ;;  %p2044_p11 = scmp.lt.s32.totalorder %s2042_s30, %s2037_s25 }
  0x84   : > { %p2041_p1 = pneg %p2040_p10  ;;  %p2045_p0 = por %p2044_p11, %p2043_p4 }
  0x86   : > { %p2046_p13 = pnand %p2045_p0, %p2041_p1 }
  0x88   : > { %2049 = shalt.err (!%p2046_p13)
}
  0x89   : > { %s2050_s27 = scalar_lea.vmem %s383_s4, 128  ;;  %s2180_s8 = smov [#allocation7]  }
  0x8a   : > { %p2051_p2 = scmp.ne.s32.totalorder %s383_s4, %s2050_s27  ;;  %s2055_s17 = sshll.u32 %s2180_s8, 4  ;;  %s2056_s17 = int_to_ptr.vmem [resolvable:$false] %s2055_s17 }
  0x8b   : > { %s2057_s28 = scalar_lea.vmem %s2056_s17, 256  ;;  %p2058_p6 = scmp.lt.s32.totalorder %s383_s4, %s2056_s17 }
  0x8c   : > { %p2053_p7 = pnand %p2051_p2, %p2355_p5  ;;  %p2059_p8 = scmp.lt.s32.totalorder %s2057_s28, %s2050_s27 }
  0x8e   : > { %p2054_p3 = pneg %p2053_p7  ;;  %p2060_p9 = por %p2059_p8, %p2058_p6 }
  0x90   : > { %p2061_p10 = pnand %p2060_p9, %p2054_p3 }
  0x92   : > { %2064 = shalt.err (!%p2061_p10)
}
  0x93   : > { %1810 = dma.hbm_to_vmem [thread:$0]  (!%p2336_p12), %s2415_s1, 128, %s383_s4, %s2349_s19  }
  0x94   : > { %p2783_p1 = scmp.ne.s32.totalorder %s2772_s23, 0 }
  0x95   : > { %s2456_s24 = sand.u32 (!%p2783_p1), 1, %s2163_s10   ;;  %p2784_p5 = scmp.ne.s32.totalorder (!%p2783_p1), %s2768_s20, 0 }
  0x96   : > { %391 = sbr.rel (%p2783_p1) target bundleno = 2387 (0x953), region = 52  ;;  %s2459_s16 = sshll.u32 (!%p2783_p1), %s2456_s24, 3 }
  0x97   : > { %s394_s15 = scalar_lea.sflag (!%p2783_p1), [#allocation3], %s2456_s24  ;;  %s397_s18 = scalar_lea.vmem (!%p2783_p1), [#allocation2], %s2459_s16 }
  0x9b   : > { %2134 = dma.done.wait (%p2784_p5), %s394_s15, 128  }
  0x9c   : > { %2136 = vsyncadd (%p2784_p5), %s394_s15, 4294967168  ;;  %s402_s1 = sand.u32 1, %s2262_s13   ;;  %s1584_s23 = sshll.u32 %s2456_s24, 4 }
  0x9d   : > { %s403_s29 = scalar_lea.sflag [#allocation6], %s402_s1  ;;  %s2469_s19 = scalar_lea.vmem [#allocation5], %s1584_s23 }
  0x9e   : > { %2138 = dma.done.wait (%p2784_p5), %s403_s29, 384  }
  0x9f   : > { %2140 = vsyncadd (%p2784_p5), %s403_s29, 4294966912  ;;  %s415_s3 = scalar_lea.vmem [#allocation7], %s2459_s16  ;;  %p2785_p12 = scmp.eq.s32.totalorder %s2262_s13, 0 }
  0xa1   : > { %2142 = dma.done.wait (%p2785_p12), [#allocation9], 2048   ;;  %p2786_p4 = pmov %p2785_p12 }
  0xa3   : > { %2144 = vsyncadd (%p2786_p4), [#allocation9], 4294965248  ;;  %p2787_p11 = pmov %p2786_p4 }
  0xa4   : > { %p2788_p0 = pmov %p2786_p4 }
  0xa5   : > { %2146 = dma.done.wait (%p2787_p11), [#allocation12], 1024  }
  0xa6   : > { %2148 = vsyncadd (%p2788_p0), [#allocation12], 4294966272  ;;  %v2181_v0 = vmov 0.0   ;;  %vm2182_vm0 = vmmov 0   ;;  %vm489_vm1 = vcmask 523264   ;;  %v488_v1 = vld [vmem:[#allocation8 + $0x38] sm:$0xff] }
  0xa7   : > { %1684 = vmatprep.subr.mxu0 %v2181_v0  ;;  %1700 = vmatprep.mubr.msk.f32.mxu0 %vm2182_vm0, %v2181_v0  ;;  %v487_v2 = vld [vmem:[#allocation8 + $0x30] sm:$0xff]  ;;  %v594_v3 = vld [vmem:[#allocation10 + $0x38] sm:$0xff]  ;;  %v486_v6 = vld [vmem:[#allocation8 + $0x28] sm:$0xff]  ;;  %s2183_s25 = smov 16   ;;  %s2184_s22 = smov 112   ;;  %vm704_vm2 = vcmask 130048  }
  0xa8   : > { %1685 = vmatpush3.xpose.msk.msra.mxu0 %vm489_vm1, %v488_v1  ;;  %v593_v4 = vld [vmem:[#allocation10 + $0x30] sm:$0xff]  ;;  %1703 = vmatprep.subr.msk.mxu1 %vm489_vm1, %v594_v3  ;;  %v592_v7 = vld [vmem:[#allocation10 + $0x28] sm:$0xff]  ;;  %v485_v8 = vld [vmem:[#allocation8 + $0x20] sm:$0xff]  ;;  %s2185_s11 = smov 80   ;;  %s2186_s30 = smov 96   ;;  %vm1240_vm3 = vcmask 261120  }
  0xa9   : > { %1686 = vmatprep.subr.mxu0 %v2181_v0  ;;  %1704 = vmatpush3.xpose.msk.msra.mxu1 %vm489_vm1, %v594_v3  ;;  %v478_v5 = vld [vmem:[%s2469_s19] sm:$0xff]  ;;  %v484_v10 = vld [vmem:[#allocation8 + $0x18] sm:$0xff]  ;;  %v482_v14 = vld [vmem:[#allocation8 + $0x8] sm:$0xff]  ;;  %s2187_s27 = smov 48   ;;  %s2188_s8 = smov 32   ;;  %vm1242_vm4 = vcmask 392192  }
  0xaa   : > { %1705 = vmatprep.subr.msk.mxu1 %vm489_vm1, %v593_v4  ;;  %1719 = vmatprep.mubr.msk.f32.mxu1 %vm489_vm1, %v478_v5  ;;  %v591_v9 = vld [vmem:[#allocation10 + $0x20] sm:$0xff]  ;;  %v590_v11 = vld [vmem:[#allocation10 + $0x18] sm:$0xff]  ;;  %v483_v12 = vld [vmem:[#allocation8 + $0x10] sm:$0xff]  ;;  %s476_s17 = scalar_lea.vmem [#allocation14], %s2459_s16  ;;  %s1635_s28 = sshll.u32 %s2262_s13, 7 }
  0xab   : > { %v589_v13 = vld [vmem:[#allocation10 + $0x10] sm:$0xff]  ;;  %v588_v15 = vld [vmem:[#allocation10 + $0x8] sm:$0xff]  ;;  %v481_v16 = vld [vmem:[#allocation8] sm:$0xff]  ;;  %s1393_s1 = scalar_lea.hbm %s2743_s9, %s1635_s28  ;;  %s1395_s23 = sshll.u32 %s476_s17, 4  ;;  %s1396_s23 = int_to_ptr.vmem [resolvable:$true] %s1395_s23 }
  0xac   : > { %1687 = vmatpush3.xpose.msk.msra.mxu0 %vm489_vm1, %v487_v2  ;;  %v587_v17 = vld [vmem:[#allocation10] sm:$0xff]  ;;  %v479_v19 = vld [vmem:[%s2469_s19 + $0x8] sm:$0xff]  ;;  %s1369_s29 = scalar_lea.sflag [#allocation15], %s2456_s24  ;;  %s2065_s19 = scalar_lea.vmem %s1396_s23, 128 }
  0xad   : > { %1688 = vmatprep.subr.mxu0 %v2181_v0  ;;  %1706 = vmatpush3.xpose.msk.msra.mxu1 %vm489_vm1, %v593_v4  ;;  %v477_v18 = vld [vmem:[%s397_s18] sm:$0xff]  ;;  %p2066_p13 = scmp.ne.s32.totalorder %s1396_s23, %s2065_s19  ;;  %p2789_p2 = scmp.ne.s32.totalorder %s2769_s21, 0 }
  0xae   : > { %1707 = vmatprep.subr.msk.mxu1 %vm489_vm1, %v592_v7  ;;  %v2531_v20 = vld [vmem:[%s2740_s6] ss:$0 sm:$0xff] }
  0xaf   : > { %754 = vrot.lane.b32.xlu1 %v2531_v20, %s2183_s25  ;;  %v2557_v38 = vld [vmem:[%s2741_s7] ss:$0 sm:$0xff]  ;;  %p2067_p7 = pnand %p2066_p13, %p2789_p2 }
  0xb0   : > { %1689 = vmatpush3.xpose.msk.msra.mxu0 %vm489_vm1, %v486_v6 }
  0xb1   : > { %1690 = vmatprep.subr.mxu0 %v2181_v0  ;;  %1708 = vmatpush3.xpose.msk.msra.mxu1 %vm489_vm1, %v592_v7  ;;  %p2068_p3 = pneg %p2067_p7 }
  0xb2   : > { %1709 = vmatprep.subr.msk.mxu1 %vm489_vm1, %v591_v9 }
  0xb4   : > { %1691 = vmatpush3.xpose.msk.msra.mxu0 %vm489_vm1, %v485_v8 }
  0xb5   : > { %1692 = vmatprep.subr.mxu0 %v2181_v0  ;;  %1710 = vmatpush3.xpose.msk.msra.mxu1 %vm489_vm1, %v591_v9 }
  0xb6   : > { %1711 = vmatprep.subr.msk.mxu1 %vm489_vm1, %v590_v11 }
  0xb8   : > { %1693 = vmatpush3.xpose.msk.msra.mxu0 %vm489_vm1, %v484_v10 }
  0xb9   : > { %1694 = vmatprep.subr.mxu0 %v2181_v0  ;;  %1712 = vmatpush3.xpose.msk.msra.mxu1 %vm489_vm1, %v590_v11 }
  0xba   : > { %1713 = vmatprep.subr.msk.mxu1 %vm489_vm1, %v589_v13 }
  0xbc   : > { %1695 = vmatpush3.xpose.msk.msra.mxu0 %vm489_vm1, %v483_v12  ;;  %v2586_v12 = vld [vmem:[%s415_s3] sm:$0xff]  ;;  %s2189_s3 = smov [#allocation14]  }
  0xbd   : > { %1696 = vmatprep.subr.mxu0 %v2181_v0  ;;  %1714 = vmatpush3.xpose.msk.msra.mxu1 %vm489_vm1, %v589_v13  ;;  %s2069_s20 = sshll.u32 %s2189_s3, 4  ;;  %s2070_s20 = int_to_ptr.vmem [resolvable:$false] %s2069_s20 }
  0xbe   : > { %1715 = vmatprep.subr.msk.mxu1 %vm489_vm1, %v588_v15  ;;  %s2071_s4 = scalar_lea.vmem %s2070_s20, 256  ;;  %p2072_p6 = scmp.lt.s32.totalorder %s1396_s23, %s2070_s20 }
  0xbf   : > { %p2073_p8 = scmp.lt.s32.totalorder %s2071_s4, %s2065_s19 }
  0xc0   : > { %1697 = vmatpush3.xpose.msk.msra.mxu0 %vm489_vm1, %v482_v14 }
  0xc1   : > { %1698 = vmatprep.subr.mxu0 %v2181_v0  ;;  %1716 = vmatpush3.xpose.msk.msra.mxu1 %vm489_vm1, %v588_v15  ;;  %p2074_p9 = por %p2073_p8, %p2072_p6 }
  0xc2   : > { %1717 = vmatprep.subr.msk.mxu1 %vm489_vm1, %v587_v17 }
  0xc3   : > { %p2075_p10 = pnand %p2074_p9, %p2068_p3 }
  0xc4   : > { %1699 = vmatpush3.xpose.msk.msra.mxu0 %vm489_vm1, %v481_v16 }
  0xc5   : > { %1750 = vmatprep.subr.mxu0 %v2181_v0  ;;  %1718 = vmatpush3.xpose.msk.msra.mxu1 %vm489_vm1, %v587_v17 }
  0xc7   : > { %1701 = vmatmul.mubr.msk.f32.vlgmr.msra.gmra.mxu0 %vm489_vm1, %v477_v18 }
  0xc8   : > { %1766 = vmatprep.mubr.msk.f32.mxu0 %vm2182_vm0, %v2181_v0  ;;  %1720 = vmatmul.mubr.msk.f32.vlgmr.msra.gmra.mxu1 %vm489_vm1, %v479_v19 }
 0x121   : > { %v755_v33 = vpop.permute.xlu1 %754 }
 0x187   : > { %v2535_v21 = vpop.f32.mrf.mxu0 }
 0x188   : > { %v728_v22 = vmul.f32 %v2535_v21, %v2535_v21  ;;  %v2540_v24 = vpop.f32.mrf.mxu1 }
 0x189   : > { %v1702_v23 = vpop.f32.mrf.mxu0  ;;  %v703_v25 = vmul.f32 %v2540_v24, %v2540_v24 }
 0x18a   : > { %744 = vrot.lane.b32.xlu0 %v728_v22, %s2184_s22  ;;  %v2545_v27 = vpop.f32.mrf.mxu1  ;;  %v729_v32 = vsel %vm704_vm2, %v728_v22, 0.0 }
 0x18b   : > { %v708_v26 = vsel %vm704_vm2, %v703_v25, 0.0  ;;  %v702_v28 = vmul.f32 %v2545_v27, %v2545_v27 }
 0x18c   : > { %709 = vadd.xlane.f32.xlu1 %v708_v26 }
 0x18d   : > { %v705_v31 = vsel %vm704_vm2, %v702_v28, 0.0 }
 0x1fc   : > { %v745_v29 = vpop.permute.xlu0 %744 }
 0x1fd   : > { %v747_v30 = vsel %vm704_vm2, %v745_v29, 0.0 }
 0x1fe   : > { %748 = vadd.xlane.f32.xlu0 %v747_v30 }
 0x202   : > { %706 = vadd.xlane.f32.xlu0 %v705_v31 }
 0x206   : > { %730 = vadd.xlane.f32.xlu0 %v729_v32 }
 0x215   : > { %v710_v34 = vpop.xlane.xlu1 %709 }
 0x216   : > { %v713_v35 = vmul.f32 0.0625, %v710_v34 }
 0x218   : > { %v715_v36 = vadd.f32 1e-06, %v713_v35 }
 0x21a   : > { %1871 = vrsqrt.f32 %v715_v36 }
 0x21c   : > { %1003 = vrot.lane.b32.xlu0 %v728_v22, %s2185_s11 }
 0x220   : > { %989 = vrot.lane.b32.xlu0 %v728_v22, %s2186_s30 }
 0x227   : > { %v1872_v37 = vpop.eup %1871 }
 0x228   : > { %v719_v39 = vmul.f32 %v1872_v37, %v2540_v24 }
 0x22a   : > { %v727_v40 = vmul.f32 %v2557_v38, %v719_v39 }
 0x22c   : > { %1722 = vmatprep.subr.msk.mxu1 %vm704_vm2, %v727_v40 }
 0x22d   : > { %1723 = vmatpush3.xpose.msk.msra.mxu1 %vm704_vm2, %v727_v40 }
 0x287   : > { %v749_v41 = vpop.xlane.xlu0 %748 }
 0x288   : > { %v750_v42 = vmul.f32 0.0625, %v749_v41 }
 0x28a   : > { %v751_v43 = vadd.f32 1e-06, %v750_v42 }
 0x28b   : > { %v707_v44 = vpop.xlane.xlu0 %706 }
 0x28c   : > { %1873 = vrsqrt.f32 %v751_v43  ;;  %v712_v45 = vmul.f32 0.0625, %v707_v44 }
 0x28e   : > { %v714_v46 = vadd.f32 1e-06, %v712_v45 }
 0x28f   : > { %v731_v47 = vpop.xlane.xlu0 %730 }
 0x290   : > { %1875 = vrsqrt.f32 %v714_v46  ;;  %v732_v48 = vmul.f32 0.0625, %v731_v47 }
 0x292   : > { %v733_v49 = vadd.f32 1e-06, %v732_v48 }
 0x293   : > { %v1004_v59 = vpop.permute.xlu0 %1003 }
 0x294   : > { %1877 = vrsqrt.f32 %v733_v49  ;;  %v1006_v60 = vsel %vm704_vm2, %v1004_v59, 0.0 }
 0x297   : > { %v990_v23 = vpop.permute.xlu0 %989 }
 0x299   : > { %v1874_v50 = vpop.eup %1873 }
 0x29a   : > { %v753_v51 = vmul.f32 %v1874_v50, %v2535_v21 }
 0x29c   : > { %v757_v52 = vmul.f32 %v755_v33, %v753_v51 }
 0x29d   : > { %v1876_v53 = vpop.eup %1875 }
 0x29e   : > { %759 = vrot.lane.b32.xlu1 %v757_v52, %s2184_s22  ;;  %v718_v54 = vmul.f32 %v1876_v53, %v2545_v27 }
 0x2a0   : > { %v726_v55 = vmul.f32 %v2557_v38, %v718_v54 }
 0x2a1   : > { %v1878_v56 = vpop.eup %1877 }
 0x2a2   : > { %966 = vrot.lane.b32.xlu1 %v703_v25, %s2184_s22  ;;  %1724 = vmatprep.subr.msk.mxu1 %vm704_vm2, %v726_v55  ;;  %v735_v57 = vmul.f32 %v1878_v56, %v2535_v21  ;;  %v992_v25 = vsel %vm704_vm2, %v990_v23, 0.0 }
 0x2a3   : > { %1725 = vmatpush3.xpose.msk.msra.mxu1 %vm704_vm2, %v726_v55 }
 0x2a4   : > { %v742_v58 = vmul.f32 %v2531_v20, %v735_v57 }
 0x2a6   : > { %964 = vrot.lane.b32.xlu1 %v702_v28, %s2184_s22  ;;  %1726 = vmatprep.mubr.msk.f32.mxu1 %vm704_vm2, %v742_v58 }
 0x2ca   : > { %1007 = vadd.xlane.f32.xlu1 %v1006_v60 }
 0x2db   : > { %1013 = vrot.lane.b32.xlu1 %v2531_v20, %s2187_s27 }
 0x2df   : > { %999 = vrot.lane.b32.xlu1 %v2531_v20, %s2188_s8 }
 0x310   : > { %v760_v61 = vpop.permute.xlu1 %759 }
 0x311   : > { %1727 = vmatmul.mubr.msk.f32.vlgmr.msra.gmra.mxu1 %vm704_vm2, %v760_v61 }
 0x314   : > { %v967_v62 = vpop.permute.xlu1 %966 }
 0x315   : > { %v973_v20 = vsel %vm704_vm2, %v967_v62, 0.0 }
 0x318   : > { %v965_v63 = vpop.permute.xlu1 %964 }
 0x319   : > { %v970_v22 = vsel %vm704_vm2, %v965_v63, 0.0 }
 0x353   : > { %v1008_v1 = vpop.xlane.xlu1 %1007 }
 0x354   : > { %v1009_v2 = vmul.f32 0.0625, %v1008_v1 }
 0x356   : > { %v1010_v3 = vadd.f32 1e-06, %v1009_v2 }
 0x357   : > { %v1014_v5 = vpop.permute.xlu1 %1013 }
 0x358   : > { %1879 = vrsqrt.f32 %v1010_v3 }
 0x35b   : > { %v1000_v13 = vpop.permute.xlu1 %999 }
 0x365   : > { %v1880_v4 = vpop.eup %1879 }
 0x366   : > { %v1012_v6 = vmul.f32 %v1880_v4, %v2535_v21 }
 0x368   : > { %v1016_v7 = vmul.f32 %v1014_v5, %v1012_v6 }
 0x36a   : > { %1018 = vrot.lane.b32.xlu1 %v1016_v7, %s2184_s22 }
 0x36e   : > { %877 = vrot.lane.b32.xlu1 %v2540_v24, %s2186_s30 }
 0x3d1   : > { %v1728_v8 = vpop.f32.mrf.mxu1 }
 0x3d2   : > { %v848_v10 = vmul.f32 0.25, %v1728_v8 }
 0x3d3   : > { %v838_v9 = vpop.f32.mrf.mxu1 }
 0x3d4   : > { %v847_v11 = vmul.f32 0.25, %v838_v9  ;;  %v850_v16 = vadd.f32 %v848_v10, %v2586_v12 }
 0x3d6   : > { %v849_v14 = vadd.f32 %v847_v11, %v2586_v12  ;;  %v854_v18 = vsel %vm704_vm2, %v850_v16, -inf }
 0x3d8   : > { %v851_v15 = vsel %vm704_vm2, %v849_v14, -inf }
 0x3d9   : > { %852 = vmax.xlane.f32.xlu0 %v851_v15 }
 0x3dc   : > { %v1019_v17 = vpop.permute.xlu1 %1018 }
 0x3dd   : > { %855 = vmax.xlane.f32.xlu0 %v854_v18 }
 0x3e0   : > { %v878_v19 = vpop.permute.xlu1 %877 }
 0x3e1   : > { %974 = vadd.xlane.f32.xlu0 %v973_v20  ;;  %1729 = vmatprep.subr.mxu1 %v878_v19 }
 0x3e2   : > { %1730 = vmatpush3.msra.mxu1 %v878_v19 }
 0x3e5   : > { %971 = vadd.xlane.f32.xlu0 %v970_v22 }
 0x3e9   : > { %993 = vadd.xlane.f32.xlu0 %v992_v25 }
 0x3ff   : > { %984 = vrot.lane.b32.xlu0 %v2557_v38, %s2183_s25 }
 0x462   : > { %v853_v26 = vpop.xlane.xlu0 %852 }
 0x463   : > { %v857_v47 = vsub.f32 %v849_v14, %v853_v26 }
 0x465   : > { %v859_v48 = vmul.f32 1.442695, %v857_v47 }
 0x466   : > { %v856_v28 = vpop.xlane.xlu0 %855 }
 0x467   : > { %v858_v29 = vsub.f32 %v850_v16, %v856_v28 }
 0x469   : > { %v861_v30 = vmul.f32 1.442695, %v858_v29 }
 0x46a   : > { %v975_v31 = vpop.xlane.xlu0 %974 }
 0x46b   : > { %1881 = vpow2.f32 %v861_v30  ;;  %v977_v32 = vmul.f32 0.0625, %v975_v31 }
 0x46d   : > { %v979_v33 = vadd.f32 1e-06, %v977_v32 }
 0x46e   : > { %v972_v34 = vpop.xlane.xlu0 %971 }
 0x46f   : > { %1883 = vrsqrt.f32 %v979_v33  ;;  %v976_v35 = vmul.f32 0.0625, %v972_v34  ;;  %v1262_v34 = vld [vmem:[#allocation11 + $0x28] sm:$0xff] }
 0x471   : > { %v978_v36 = vadd.f32 1e-06, %v976_v35  ;;  %v1261_v35 = vld [vmem:[#allocation11 + $0x20] sm:$0xff] }
 0x472   : > { %v994_v39 = vpop.xlane.xlu0 %993 }
 0x473   : > { %1885 = vrsqrt.f32 %v978_v36  ;;  %v995_v49 = vmul.f32 0.0625, %v994_v39  ;;  %v1260_v36 = vld [vmem:[#allocation11 + $0x18] sm:$0xff]  ;;  %v1258_v39 = vld [vmem:[#allocation11 + $0x8] sm:$0xff] }
 0x474   : > { %1887 = vpow2.f32 %v859_v48 }
 0x475   : > { %v996_v50 = vadd.f32 1e-06, %v995_v49 }
 0x476   : > { %v985_v38 = vpop.permute.xlu0 %984 }
 0x477   : > { %1889 = vrsqrt.f32 %v996_v50 }
 0x478   : > { %v1882_v37 = vpop.eup %1881 }
 0x479   : > { %v866_v40 = vsel %vm704_vm2, %v1882_v37, 0.0 }
 0x47a   : > { %867 = vadd.xlane.f32.xlu0 %v866_v40  ;;  %v1257_v40 = vld [vmem:[#allocation11] sm:$0xff] }
 0x47c   : > { %v1884_v41 = vpop.eup %1883 }
 0x47d   : > { %v983_v42 = vmul.f32 %v1884_v41, %v2540_v24 }
 0x47f   : > { %v988_v43 = vmul.f32 %v985_v38, %v983_v42 }
 0x480   : > { %v1886_v44 = vpop.eup %1885 }
 0x481   : > { %v982_v45 = vmul.f32 %v1886_v44, %v2545_v27  ;;  %1029 = vrot.lane.b32.xlu1 %v988_v43, %s2184_s22  ;;  %v1888_v51 = vpop.eup %1887 }
 0x482   : > { %v863_v52 = vsel %vm704_vm2, %v1888_v51, 0.0 }
 0x483   : > { %v987_v46 = vmul.f32 %v985_v38, %v982_v45 }
 0x484   : > { %v1890_v53 = vpop.eup %1889 }
 0x485   : > { %1027 = vrot.lane.b32.xlu1 %v987_v46, %s2184_s22  ;;  %v998_v54 = vmul.f32 %v1890_v53, %v2535_v21 }
 0x487   : > { %v1002_v55 = vmul.f32 %v1000_v13, %v998_v54 }
 0x490   : > { %875 = vrot.lane.b32.xlu0 %v2545_v27, %s2186_s30 }
 0x494   : > { %1023 = vrot.lane.b32.xlu0 %v1019_v17, %s2186_s30 }
 0x4a9   : > { %864 = vadd.xlane.f32.xlu1 %v863_v52 }
 0x4ba   : > { %1021 = vrot.lane.b32.xlu1 %v1002_v55, %s2186_s30 }
 0x4f3   : > { %v1030_v58 = vpop.permute.xlu1 %1029 }
 0x4f7   : > { %v1028_v59 = vpop.permute.xlu1 %1027 }
 0x503   : > { %v868_v56 = vpop.xlane.xlu0 %867 }
 0x504   : > { %1891 = vrcp.f32 %v868_v56 }
 0x507   : > { %v876_v57 = vpop.permute.xlu0 %875 }
 0x508   : > { %1731 = vmatprep.subr.mxu1 %v876_v57 }
 0x509   : > { %1732 = vmatpush3.msra.mxu1 %v876_v57 }
 0x50a   : > { %1736 = vmatprep.subr.msk.mxu1 %vm704_vm2, %v1030_v58 }
 0x50b   : > { %v1024_v2 = vpop.permute.xlu0 %1023 }
 0x511   : > { %v1892_v61 = vpop.eup %1891 }
 0x512   : > { %v2611_v1 = vmul.f32 %v1892_v61, %v1882_v37  ;;  %v1259_v37 = vld [vmem:[#allocation11 + $0x10] sm:$0xff] }
 0x532   : > { %v865_v60 = vpop.xlane.xlu1 %864 }
 0x533   : > { %1893 = vrcp.f32 %v865_v60 }
 0x536   : > { %v1022_v21 = vpop.permute.xlu1 %1021 }
 0x540   : > { %v1894_v62 = vpop.eup %1893 }
 0x541   : > { %v2609_v63 = vmul.f32 %v1894_v62, %v1888_v51 }
 0x543   : > { %1733 = vmatprep.mubr.msk.f32.mxu1 %vm704_vm2, %v2609_v63 }
 0x544   : > { %1734 = vmatmul.mubr.msk.f32.vlgmr.msra.gmra.mxu1 %vm704_vm2, %v2611_v1 }
 0x545   : > { %1737 = vmatpush3.xpose.msk.msra.mxu1 %vm704_vm2, %v1030_v58  ;;  %1740 = vmatprep.mubr.msk.f32.mxu1 %vm704_vm2, %v1022_v21 }
 0x546   : > { %1738 = vmatprep.subr.msk.mxu1 %vm704_vm2, %v1028_v59 }
 0x549   : > { %1739 = vmatpush3.xpose.msk.msra.mxu1 %vm704_vm2, %v1028_v59 }
 0x54c   : > { %1741 = vmatmul.mubr.msk.f32.vlgmr.msra.gmra.mxu1 %vm704_vm2, %v1024_v2 }
 0x604   : > { %v1735_v3 = vpop.f32.mrf.mxu1 }
 0x606   : > { %v2622_v4 = vpop.f32.mrf.mxu1 }
 0x60c   : > { %v1742_v5 = vpop.f32.mrf.mxu1 }
 0x60d   : > { %v1115_v6 = vmul.f32 0.25, %v1742_v5 }
 0x60e   : > { %v1105_v7 = vpop.f32.mrf.mxu1 }
 0x60f   : > { %v1114_v8 = vmul.f32 0.25, %v1105_v7  ;;  %v1117_v9 = vadd.f32 %v1115_v6, %v2586_v12 }
 0x611   : > { %v1121_v10 = vsel %vm704_vm2, %v1117_v9, -inf  ;;  %v1116_v11 = vadd.f32 %v1114_v8, %v2586_v12 }
 0x612   : > { %1122 = vmax.xlane.f32.xlu0 %v1121_v10 }
 0x613   : > { %v1118_v13 = vsel %vm704_vm2, %v1116_v11, -inf }
 0x614   : > { %1119 = vmax.xlane.f32.xlu1 %v1118_v13 }
 0x69b   : > { %v1123_v14 = vpop.xlane.xlu0 %1122 }
 0x69c   : > { %v1125_v15 = vsub.f32 %v1117_v9, %v1123_v14 }
 0x69d   : > { %v1120_v16 = vpop.xlane.xlu1 %1119 }
 0x69e   : > { %v1128_v17 = vmul.f32 1.442695, %v1125_v15  ;;  %v1124_v18 = vsub.f32 %v1116_v11, %v1120_v16 }
 0x6a0   : > { %1895 = vpow2.f32 %v1128_v17  ;;  %v1126_v19 = vmul.f32 1.442695, %v1124_v18 }
 0x6a2   : > { %1897 = vpow2.f32 %v1126_v19 }
 0x6ad   : > { %v1896_v20 = vpop.eup %1895 }
 0x6ae   : > { %v1133_v22 = vsel %vm704_vm2, %v1896_v20, 0.0 }
 0x6af   : > { %v1898_v23 = vpop.eup %1897  ;;  %1134 = vadd.xlane.f32.xlu1 %v1133_v22 }
 0x6b0   : > { %v1130_v25 = vsel %vm704_vm2, %v1898_v23, 0.0 }
 0x6b1   : > { %1131 = vadd.xlane.f32.xlu0 %v1130_v25 }
 0x6c0   : > { %1140 = vrot.lane.b32.xlu1 %v2545_v27, %s2185_s11  ;;  %v1264_v27 = vld [vmem:[#allocation11 + $0x38] sm:$0xff] }
 0x6c1   : > { %1751 = vmatpush3.xpose.msk.msra.mxu0 %vm489_vm1, %v1264_v27 }
 0x6c2   : > { %1752 = vmatprep.subr.mxu0 %v2181_v0 }
 0x6c4   : > { %1228 = vrot.lane.b32.xlu1 %v1735_v3, %s2183_s25 }
 0x6c7   : > { %1142 = vrot.lane.b32.xlu0 %v2540_v24, %s2185_s11  ;;  %v1263_v24 = vld [vmem:[#allocation11 + $0x30] sm:$0xff] }
 0x6c8   : > { %1753 = vmatpush3.xpose.msk.msra.mxu0 %vm489_vm1, %v1263_v24 }
 0x6c9   : > { %1754 = vmatprep.subr.mxu0 %v2181_v0 }
 0x6cc   : > { %1755 = vmatpush3.xpose.msk.msra.mxu0 %vm489_vm1, %v1262_v34 }
 0x6cd   : > { %1756 = vmatprep.subr.mxu0 %v2181_v0 }
 0x6d0   : > { %1757 = vmatpush3.xpose.msk.msra.mxu0 %vm489_vm1, %v1261_v35 }
 0x6d1   : > { %1758 = vmatprep.subr.mxu0 %v2181_v0 }
 0x6d4   : > { %1759 = vmatpush3.xpose.msk.msra.mxu0 %vm489_vm1, %v1260_v36 }
 0x6d5   : > { %1760 = vmatprep.subr.mxu0 %v2181_v0 }
 0x6d8   : > { %1761 = vmatpush3.xpose.msk.msra.mxu0 %vm489_vm1, %v1259_v37 }
 0x6d9   : > { %1762 = vmatprep.subr.mxu0 %v2181_v0 }
 0x6dc   : > { %1763 = vmatpush3.xpose.msk.msra.mxu0 %vm489_vm1, %v1258_v39 }
 0x6dd   : > { %1764 = vmatprep.subr.mxu0 %v2181_v0 }
 0x6e0   : > { %1765 = vmatpush3.xpose.msk.msra.mxu0 %vm489_vm1, %v1257_v40 }
 0x738   : > { %v1135_v12 = vpop.xlane.xlu1 %1134 }
 0x739   : > { %1899 = vrcp.f32 %v1135_v12 }
 0x73a   : > { %v1132_v26 = vpop.xlane.xlu0 %1131 }
 0x73b   : > { %1901 = vrcp.f32 %v1132_v26 }
 0x73c   : > { %v1141_v29 = vpop.permute.xlu1 %1140 }
 0x73e   : > { %v1143_v28 = vpop.permute.xlu0 %1142 }
 0x73f   : > { %1743 = vmatprep.subr.mxu1 %v1143_v28 }
 0x740   : > { %1744 = vmatpush3.msra.mxu1 %v1143_v28  ;;  %v1229_v42 = vpop.permute.xlu1 %1228 }
 0x741   : > { %1745 = vmatprep.subr.mxu1 %v1141_v29  ;;  %v1239_v0 = vsel %vm704_vm2, %v2622_v4, %v1229_v42 }
 0x742   : > { %1746 = vmatpush3.msra.mxu1 %v1141_v29 }
 0x746   : > { %v1900_v30 = vpop.eup %1899 }
 0x747   : > { %v1139_v33 = vmul.f32 %v1900_v30, %v1896_v20 }
 0x748   : > { %v1902_v31 = vpop.eup %1901 }
 0x749   : > { %v1137_v32 = vmul.f32 %v1902_v31, %v1898_v23 }
 0x74b   : > { %1747 = vmatprep.mubr.msk.f32.mxu1 %vm704_vm2, %v1137_v32 }
 0x74c   : > { %1748 = vmatmul.mubr.msk.f32.vlgmr.msra.gmra.mxu1 %vm704_vm2, %v1139_v33 }
 0x80c   : > { %v1749_v41 = vpop.f32.mrf.mxu1 }
 0x80d   : > { %1236 = vrot.lane.b32.xlu1 %v1749_v41, %s2187_s27 }
 0x80e   : > { %v1218_v38 = vpop.f32.mrf.mxu1 }
 0x80f   : > { %1232 = vrot.lane.b32.xlu0 %v1218_v38, %s2188_s8 }
 0x811   : > { %1247 = vrot.lane.b32.xlu1 %v1137_v32, %s2188_s8 }
 0x813   : > { %1244 = vrot.lane.b32.xlu0 %v2611_v1, %s2183_s25 }
 0x817   : > { %1250 = vrot.lane.b32.xlu0 %v1139_v33, %s2187_s27 }
 0x87f   : > { %v1237_v44 = vpop.permute.xlu1 %1236 }
 0x881   : > { %v1233_v43 = vpop.permute.xlu0 %1232 }
 0x882   : > { %v1241_v45 = vsel %vm1240_vm3, %v1239_v0, %v1233_v43 }
 0x883   : > { %v1243_v46 = vsel %vm1242_vm4, %v1241_v45, %v1237_v44  ;;  %v1248_v49 = vpop.permute.xlu1 %1247 }
 0x884   : > { %1767 = vmatmul.mubr.msk.f32.vlgmr.msra.gmra.mxu0 %vm489_vm1, %v1243_v46 }
 0x885   : > { %v1245_v47 = vpop.permute.xlu0 %1244 }
 0x886   : > { %v1253_v48 = vsel %vm704_vm2, %v2609_v63, %v1245_v47 }
 0x887   : > { %v1254_v51 = vsel %vm1240_vm3, %v1253_v48, %v1248_v49 }
 0x889   : > { %v1251_v50 = vpop.permute.xlu0 %1250 }
 0x88a   : > { %v1255_v52 = vsel %vm1242_vm4, %v1254_v51, %v1251_v50 }
 0x88b   : > { %1256 = vst.msk [vmem:[%s476_s17] sm:$0xff] %vm489_vm1, %v1255_v52 }
 0x88c   : > { %2078 = shalt.err (!%p2075_p10)
}
 0x88d   : > { %s2079_s25 = scalar_lea.hbm %s1393_s1, 128  ;;  %s2083_s30 = scalar_lea.hbm %s2743_s9, 256 }
 0x88e   : > { %p2080_p1 = scmp.ne.s32.totalorder %s1393_s1, %s2079_s25  ;;  %p2084_p4 = scmp.lt.s32.totalorder %s1393_s1, %s2743_s9 }
 0x88f   : > { %p2085_p11 = scmp.lt.s32.totalorder %s2083_s30, %s2079_s25 }
 0x890   : > { %p2081_p5 = pnand %p2080_p1, %p2789_p2 }
 0x891   : > { %p2086_p0 = por %p2085_p11, %p2084_p4 }
 0x892   : > { %p2082_p12 = pneg %p2081_p5 }
 0x894   : > { %p2087_p13 = pnand %p2086_p0, %p2082_p12 }
 0x896   : > { %2090 = shalt.err (!%p2087_p13)
}
 0x897   : > { %1788 = dma.vmem_to_hbm [thread:$0]  (%p2789_p2), %s1396_s23, 128, %s1393_s1, %s1369_s29  }
 0x898   : > { %s469_s27 = scalar_lea.vmem [#allocation13], %s2459_s16  ;;  %s2790_s18 = sld [smem:[#allocation30_spill]] }
 0x899   : > { %s1382_s8 = sshll.u32 %s469_s27, 4  ;;  %s1364_s3 = scalar_lea.sflag [#allocation4], %s2456_s24  ;;  %s2692_s8 = int_to_ptr.vmem [resolvable:$true] %s1382_s8 }
 0x89a   : > { %s2091_s20 = scalar_lea.vmem %s2692_s8, 128  ;;  %s2190_s13 = smov [#allocation13]  }
 0x89b   : > { %p2092_p7 = scmp.ne.s32.totalorder %s2692_s8, %s2091_s20  ;;  %s2095_s16 = sshll.u32 %s2190_s13, 4  ;;  %s2096_s16 = int_to_ptr.vmem [resolvable:$false] %s2095_s16 }
 0x89c   : > { %p2098_p8 = scmp.lt.s32.totalorder %s2692_s8, %s2096_s16 }
 0x89d   : > { %p2093_p3 = pnand %p2092_p7, %p2789_p2 }
 0x89e   : > { %s2690_s19 = scalar_lea.hbm %s2790_s18, %s1635_s28  ;;  %s2097_s28 = scalar_lea.vmem %s2096_s16, 256 }
 0x89f   : > { %p2094_p6 = pneg %p2093_p3  ;;  %p2099_p9 = scmp.lt.s32.totalorder %s2097_s28, %s2091_s20 }
 0x8a1   : > { %p2100_p10 = por %p2099_p9, %p2098_p8 }
 0x8a3   : > { %p2101_p1 = pnand %p2100_p10, %p2094_p6 }
 0x944   : > { %v1358_v53 = vpop.f32.mrf.mxu0 }
 0x945   : > { %1362 = vst.msk [vmem:[%s469_s27] sm:$0xff] %vm489_vm1, %v1358_v53 }
 0x946   : > { %v1768_v54 = vpop.f32.mrf.mxu0 }
 0x947   : > { %2104 = shalt.err (!%p2101_p1)
}
 0x948   : > { %s2105_s1 = scalar_lea.hbm %s2690_s19, 128  ;;  %s2109_s29 = scalar_lea.hbm %s2790_s18, 256 }
 0x949   : > { %p2106_p5 = scmp.ne.s32.totalorder %s2690_s19, %s2105_s1  ;;  %p2110_p11 = scmp.lt.s32.totalorder %s2690_s19, %s2790_s18 }
 0x94a   : > { %p2111_p0 = scmp.lt.s32.totalorder %s2109_s29, %s2105_s1 }
 0x94b   : > { %p2107_p12 = pnand %p2106_p5, %p2789_p2 }
 0x94c   : > { %p2112_p13 = por %p2111_p0, %p2110_p11 }
 0x94d   : > { %p2108_p4 = pneg %p2107_p12 }
 0x94f   : > { %p2113_p7 = pnand %p2112_p13, %p2108_p4 }
 0x951   : > { %2116 = shalt.err (!%p2113_p7)
}
 0x952   : > { %1787 = dma.vmem_to_hbm [thread:$0]  (%p2789_p2), %s2692_s8, 128, %s2690_s19, %s1364_s3  }
 0x953 PF: > { %s2791_s22 = sld [smem:[#allocation22_spill]]  ;;  %p2794_p6 = scmp.ge.s32.totalorder %s2171_s12, 2 }
 0x954   : > { %s2792_s11 = sld [smem:[#allocation26_spill]] }
 0x959   : > { %s1407_s30 = sand.u32 1, %s2791_s22  }
 0x95a   : > { %p2793_p3 = scmp.ne.s32.totalorder %s2792_s11, 0  ;;  %s1408_s14 = scalar_lea.sflag [#allocation4], %s1407_s30 }
 0x95c   : > { %p1812_p8 = pnand %p2794_p6, %p2793_p3 }
 0x95e   : > { %p1813_p9 = pneg %p1812_p8 }
 0x960   : > { %2150 = dma.done.wait (%p1813_p9), %s1408_s14, 128  }
 0x961   : > { %2152 = vsyncadd (%p1813_p9), %s1408_s14, 4294967168  ;;  %s1417_s26 = scalar_lea.sflag [#allocation15], %s1407_s30 }
 0x962   : > { %2154 = dma.done.wait (%p1813_p9), %s1417_s26, 128  }
 0x963   : > { %2156 = vsyncadd (%p1813_p9), %s1417_s26, 4294967168  ;;  %s2795_s12 = sld [smem:[#allocation24_spill]]  ;;  %s2798_s30 = smov %s2163_s10 }
 0x964   : > { %s2796_s21 = sld [smem:[#allocation23_spill]] }
 0x965   : > { %s2797_s11 = sld [smem:[#allocation25_spill]] }
 0x969   : > { %p31_p2 = scmp.ge.s32.totalorder %s2795_s12, 4  }
 0x96a   : > { %s2799_s10 = smov %s2796_s21 }
 0x96b   :  { %33 = sbr.rel (!%p31_p2) target bundleno = 16 (0x10), region = 150 }
 0x970   :  { %1422 = vsyncpa [#allocation3], 1 }
 0x971   :  { %1424 = vsyncpa [#allocation3 + $0x1], 1 }
 0x972   :  { %1425 = vsyncpa [#allocation6], 1 }
 0x973   :  { %1427 = vsyncpa [#allocation6 + $0x1], 1 }
 0x974   :  { %1428 = vsyncpa [#allocation9], 1 }
 0x975   :  { %1429 = vsyncpa [#allocation12], 1 }
 0x976   :  { %1430 = vsyncpa [#allocation4], 1 }
 0x977   :  { %1432 = vsyncpa [#allocation4 + $0x1], 1 }
 0x978   :  { %1433 = vsyncpa [#allocation15], 1 }
 0x979   :  { %1435 = vsyncpa [#allocation15 + $0x1], 1 }

</bundles_post_ra>
